<compile_context>
chip_gen: v6e
topology: v6e:2x2x1
jax: 0.10.0
libtpu: 0.0.40
codegen_flags: <defaults>
</compile_context>

<pallas_src>
import math
import jax
import jax.numpy as jnp
from jax import lax
from jax.experimental import pallas as pl
from jax.experimental.pallas import tpu as pltpu

# Small, module-consistent shapes.
N, L, D, H, I = 2, 8, 32, 4, 64          # batch, seq, hidden, heads, intermediate
NL = N * L
DH = D // H                               # attention head size
LN_EPS = 1e-12


# ----------------------------- in-kernel math helpers -----------------------------

def _layernorm_fast(x, g, b, eps=LN_EPS):
    u = jnp.mean(x, axis=-1, keepdims=True)
    d = x - u
    s = jnp.mean(d * d, axis=-1, keepdims=True)
    return g * (d * lax.rsqrt(s + eps)) + b


def _mish_fast(x):
    # torch.nn.Mish: x * tanh(softplus(x)).
    # Single-exponential, cancellation-free rewrite: with e = exp(x),
    #   tanh(log1p(e)) = e*(e+2) / (e*(e+2) + 2)
    # (overflow guard: mish(x) == x for x > 20 to fp32 precision).
    e = jnp.exp(jnp.minimum(x, 20.0))
    num = e * (e + 2.0)
    t = num / (num + 2.0)
    return jnp.where(x > 20.0, x, x * t)


# ----------------------------------- the kernel ------------------------------------

def bert_layer_kernel(x_ref, abias_ref, wqkv_ref, wao_ref, wi_ref, wo_ref,
                      bqkv_ref, bi_ref, bln_ref, out_ref):
    """One program per batch: L rows, all weights resident in VMEM."""
    bf16 = jnp.bfloat16
    x = x_ref[...]                        # (L, D)  f32
    abias = abias_ref[...]                # (L, L)  additive key-mask bias (rows identical)
    bln = bln_ref[...]                    # (8, D)  [bao, bo, g1, b1, g2, b2, 0, 0]
    bao, bo = bln[0:1, :], bln[1:2, :]
    g1, b1 = bln[2:3, :], bln[3:4, :]
    g2, b2 = bln[4:5, :], bln[5:6, :]
    wao = wao_ref[...]                    # (D, D)  f32: keeps per-head sublane slices tile-aligned

    # --- BertSelfAttention: fused QKV projection, biases folded into one (1,3D) add ---
    qkv = jnp.dot(x.astype(bf16), wqkv_ref[...],
                  preferred_element_type=jnp.float32) + bqkv_ref[...]    # (L, 3D) f32
    q = qkv[:, :D]                                                       # already 1/sqrt(DH)-scaled
    kT = jnp.transpose(qkv[:, D:2 * D])                                  # (D, L): one up-front transpose
    v = qkv[:, 2 * D:]

    # Per-head attention; per-head kT / wao slices are sublane picks at multiples of 8.
    attn = jnp.zeros((L, D), jnp.float32)
    for h in range(H):                                                   # static, H = 4
        cs = slice(h * DH, (h + 1) * DH)
        s = jnp.dot(q[:, cs].astype(bf16), kT[cs, :].astype(bf16),
                    preferred_element_type=jnp.float32)                  # (L, L)
        s = s + abias
        s = s - jnp.max(s, axis=-1, keepdims=True)                       # stable softmax
        p = jnp.exp(s)
        p = p * pl.reciprocal(jnp.sum(p, axis=-1, keepdims=True), approx=True)
        ctx = jnp.dot(p.astype(bf16), v[:, cs].astype(bf16),
                      preferred_element_type=jnp.float32)                # (L, DH)
        # fold the per-head slice of the output projection: ctx @ Wao[h*DH:(h+1)*DH, :]
        attn = attn + jnp.dot(ctx.astype(bf16), wao[cs, :].astype(bf16),
                              preferred_element_type=jnp.float32)
    attn = attn + bao

    # --- BertSelfOutput: residual + LayerNorm (dropout prob = 0 at epoch 0) ---
    h1 = _layernorm_fast(attn + x, g1, b1)

    # --- BertIntermediate: dense + Mish ("gelu" in the reference code) ---
    inter = jnp.dot(h1.astype(bf16), wi_ref[...],
                    preferred_element_type=jnp.float32) + bi_ref[...]    # (L, I)
    inter = _mish_fast(inter)

    # --- BertOutput: single (I, D) dense + residual + LayerNorm ---
    ffn = jnp.dot(inter.astype(bf16), wo_ref[...],
                  preferred_element_type=jnp.float32) + bo
    out_ref[...] = _layernorm_fast(ffn + h1, g2, b2)


# ----------------------------------- the wrapper ------------------------------------

def _pack_params(params):
    """Prepare weights/biases: fold 1/sqrt(DH) into Wq/bq, bf16 weights, packed biases."""
    scale = 1.0 / math.sqrt(DH)
    w_qkv = jnp.concatenate([params["wq"] * scale, params["wk"], params["wv"]],
                            axis=1).astype(jnp.bfloat16)                 # (D, 3D)
    b_qkv = jnp.concatenate([params["bq"] * scale, params["bk"], params["bv"]],
                            axis=1).astype(jnp.float32)                  # (1, 3D)
    wao = params["wao"].astype(jnp.float32)                              # (D, D) f32 (aligned slices)
    wi = params["wi"].astype(jnp.bfloat16)                               # (D, I)
    wo = params["wo"].astype(jnp.bfloat16)                               # (I, D) single operand
    bi = params["bi"].astype(jnp.float32)                                # (1, I)
    bln = jnp.concatenate([params["bao"], params["bo"],
                           params["g1"], params["b1"],
                           params["g2"], params["b2"],
                           jnp.zeros((2, D), jnp.float32)], axis=0).astype(jnp.float32)  # (8, D)
    return w_qkv, wao, wi, wo, b_qkv, bi, bln


def bert_layer_forward(hidden_states, attention_mask, params):
    """hidden_states: (N, L, D) f32; attention_mask: (N, L) f32 (1 = keep, 0 = pad)."""
    x2d = hidden_states.reshape(NL, D).astype(jnp.float32)

    # Per-batch additive key bias, pre-broadcast over the query rows so every program
    # reads an (L, L) tile with identical rows (wrapper-side, 512 bytes total).
    key_bias = ((1.0 - attention_mask) * -10000.0).astype(jnp.float32)          # (N, L)
    abias = jnp.broadcast_to(key_bias[:, None, :], (N, L, L)).reshape(NL, L)     # (NL, L)

    packed = _pack_params(params)

    out2d = pl.pallas_call(
        bert_layer_kernel,
        out_shape=jax.ShapeDtypeStruct((NL, D), jnp.float32),
        grid_spec=pltpu.PrefetchScalarGridSpec(
            num_scalar_prefetch=0,
            grid=(N,),                                       # one program per batch (parallel)
            in_specs=[
                pl.BlockSpec((L, D), lambda i: (i, 0)),      # hidden rows of batch i
                pl.BlockSpec((L, L), lambda i: (i, 0)),      # additive attention bias tile
                pl.BlockSpec((D, 3 * D), lambda i: (0, 0)),  # W_qkv   (bf16, resident)
                pl.BlockSpec((D, D), lambda i: (0, 0)),      # W_attn_out (f32, resident)
                pl.BlockSpec((D, I), lambda i: (0, 0)),      # W_intermediate (bf16)
                pl.BlockSpec((I, D), lambda i: (0, 0)),      # W_output (bf16, un-split)
                pl.BlockSpec((1, 3 * D), lambda i: (0, 0)),  # fused QKV bias
                pl.BlockSpec((1, I), lambda i: (0, 0)),      # intermediate bias
                pl.BlockSpec((8, D), lambda i: (0, 0)),      # [bao, bo, g1, b1, g2, b2, 0, 0]
            ],
            out_specs=pl.BlockSpec((L, D), lambda i: (i, 0)),
        ),
        compiler_params=pltpu.CompilerParams(dimension_semantics=("parallel",)),
    )(x2d, abias, *packed)

    return out2d.reshape(N, L, D)


# ------------------------------ params / pure-JAX reference -------------------------

def init_params(key):
    ks = jax.random.split(key, 8)
    std = 0.02
    return {
        "wq": jax.random.normal(ks[0], (D, D), jnp.float32) * std,
        "bq": jnp.zeros((1, D), jnp.float32),
        "wk": jax.random.normal(ks[1], (D, D), jnp.float32) * std,
        "bk": jnp.zeros((1, D), jnp.float32),
        "wv": jax.random.normal(ks[2], (D, D), jnp.float32) * std,
        "bv": jnp.zeros((1, D), jnp.float32),
        "wao": jax.random.normal(ks[3], (D, D), jnp.float32) * std,
        "bao": jnp.zeros((1, D), jnp.float32),
        "g1": jnp.ones((1, D), jnp.float32),     # BertLayerNorm init: weight=1, bias=0
        "b1": jnp.zeros((1, D), jnp.float32),
        "wi": jax.random.normal(ks[4], (D, I), jnp.float32) * std,
        "bi": jnp.zeros((1, I), jnp.float32),
        "wo": jax.random.normal(ks[5], (I, D), jnp.float32) * std,
        "bo": jnp.zeros((1, D), jnp.float32),
        "g2": jnp.ones((1, D), jnp.float32),
        "b2": jnp.zeros((1, D), jnp.float32),
    }
    # memory_intermediate params exist in __init__ but are unused in forward -> not needed.


def _layernorm_ref(x, g, b, eps=LN_EPS):
    u = jnp.mean(x, axis=-1, keepdims=True)
    s = jnp.mean((x - u) ** 2, axis=-1, keepdims=True)
    return g * ((x - u) / jnp.sqrt(s + eps)) + b


def _mish_ref(x):
    sp = jnp.where(x > 20.0, x, jnp.log1p(jnp.exp(jnp.minimum(x, 20.0))))
    return x * jnp.tanh(sp)


def reference_forward(x, mask, p):
    """Pure-JAX reference mirroring the PyTorch module (epoch=0, diagonal_mask=False)."""
    mb = ((1.0 - mask) * -10000.0)[:, None, None, :]                # (N,1,1,L)
    q = x @ p["wq"] + p["bq"]
    k = x @ p["wk"] + p["bk"]
    v = x @ p["wv"] + p["bv"]
    split = lambda t: t.reshape(N, L, H, DH).transpose(0, 2, 1, 3)  # (N,H,L,DH)
    qh, kh, vh = split(q), split(k), split(v)
    s = jnp.einsum("nhqd,nhkd->nhqk", qh, kh) / math.sqrt(DH) + mb
    pr = jax.nn.softmax(s, axis=-1)
    ctx = jnp.einsum("nhqk,nhkd->nhqd", pr, vh).transpose(0, 2, 1, 3).reshape(N, L, D)
    attn = ctx @ p["wao"] + p["bao"]
    h1 = _layernorm_ref(attn + x, p["g1"], p["b1"])
    inter = _mish_ref(h1 @ p["wi"] + p["bi"])
    ffn = inter @ p["wo"] + p["bo"]
    return _layernorm_ref(ffn + h1, p["g2"], p["b2"])


if __name__ == "__main__":
    key = jax.random.PRNGKey(0)
    kx, kp = jax.random.split(key)
    hidden_states = jax.random.normal(kx, (N, L, D), jnp.float32)
    # attention mask with some padded positions in batch 1
    attention_mask = jnp.ones((N, L), jnp.float32).at[1, 6:].set(0.0)
    params = init_params(kp)

    out = bert_layer_forward(hidden_states, attention_mask, params)
    out = jax.block_until_ready(out)

    ref = reference_forward(hidden_states, attention_mask, params)
    assert out.shape == (N, L, D)
    assert jnp.allclose(out, ref, atol=2e-3, rtol=2e-3), "kernel/reference mismatch"
    print("KERNEL_OK")
</pallas_src>

<mosaic_0001>
module attributes {stable_mosaic.version = 11 : i64} {
  func.func @bert_layer_kernel(%arg0: i32, %arg1: memref<8x32xf32, #tpu.memory_space<vmem>>, %arg2: memref<8x8xf32, #tpu.memory_space<vmem>>, %arg3: memref<32x96xbf16, #tpu.memory_space<vmem>>, %arg4: memref<32x32xf32, #tpu.memory_space<vmem>>, %arg5: memref<32x64xbf16, #tpu.memory_space<vmem>>, %arg6: memref<64x32xbf16, #tpu.memory_space<vmem>>, %arg7: memref<1x96xf32, #tpu.memory_space<vmem>>, %arg8: memref<1x64xf32, #tpu.memory_space<vmem>>, %arg9: memref<8x32xf32, #tpu.memory_space<vmem>>, %arg10: memref<8x32xf32, #tpu.memory_space<vmem>>) attributes {dimension_semantics = [#tpu.dimension_semantics<parallel>], iteration_bounds = array<i64: 2>, scalar_prefetch = 0 : i64, scratch_operands = 0 : i64, tpu.core_type = #tpu.core_type<tc>, window_params = [{transform_indices = @transform_0, window_bounds = array<i64: 8, 32>}, {transform_indices = @transform_1, window_bounds = array<i64: 8, 8>}, {pipeline_mode = #tpu.pipeline_mode<synchronous>, transform_indices = @transform_2, window_bounds = array<i64: 32, 96>}, {pipeline_mode = #tpu.pipeline_mode<synchronous>, transform_indices = @transform_3, window_bounds = array<i64: 32, 32>}, {pipeline_mode = #tpu.pipeline_mode<synchronous>, transform_indices = @transform_4, window_bounds = array<i64: 32, 64>}, {pipeline_mode = #tpu.pipeline_mode<synchronous>, transform_indices = @transform_5, window_bounds = array<i64: 64, 32>}, {pipeline_mode = #tpu.pipeline_mode<synchronous>, transform_indices = @transform_6, window_bounds = array<i64: 1, 96>}, {pipeline_mode = #tpu.pipeline_mode<synchronous>, transform_indices = @transform_7, window_bounds = array<i64: 1, 64>}, {pipeline_mode = #tpu.pipeline_mode<synchronous>, transform_indices = @transform_8, window_bounds = array<i64: 8, 32>}, {transform_indices = @transform_9, window_bounds = array<i64: 8, 32>}]} {
    %c0 = arith.constant 0 : index
    %c0_0 = arith.constant 0 : index
    %0 = vector.load %arg1[%c0, %c0_0] : memref<8x32xf32, #tpu.memory_space<vmem>>, vector<8x32xf32>
    %c0_1 = arith.constant 0 : index
    %c0_2 = arith.constant 0 : index
    %1 = vector.load %arg2[%c0_1, %c0_2] : memref<8x8xf32, #tpu.memory_space<vmem>>, vector<8x8xf32>
    %c0_3 = arith.constant 0 : index
    %c0_4 = arith.constant 0 : index
    %2 = vector.load %arg9[%c0_3, %c0_4] : memref<8x32xf32, #tpu.memory_space<vmem>>, vector<8x32xf32>
    %3 = vector.extract_strided_slice %2 {offsets = [0, 0], sizes = [1, 32], strides = [1, 1]} : vector<8x32xf32> to vector<1x32xf32>
    %4 = vector.extract_strided_slice %2 {offsets = [1, 0], sizes = [1, 32], strides = [1, 1]} : vector<8x32xf32> to vector<1x32xf32>
    %5 = vector.extract_strided_slice %2 {offsets = [2, 0], sizes = [1, 32], strides = [1, 1]} : vector<8x32xf32> to vector<1x32xf32>
    %6 = vector.extract_strided_slice %2 {offsets = [3, 0], sizes = [1, 32], strides = [1, 1]} : vector<8x32xf32> to vector<1x32xf32>
    %7 = vector.extract_strided_slice %2 {offsets = [4, 0], sizes = [1, 32], strides = [1, 1]} : vector<8x32xf32> to vector<1x32xf32>
    %8 = vector.extract_strided_slice %2 {offsets = [5, 0], sizes = [1, 32], strides = [1, 1]} : vector<8x32xf32> to vector<1x32xf32>
    %c0_5 = arith.constant 0 : index
    %c0_6 = arith.constant 0 : index
    %9 = vector.load %arg4[%c0_5, %c0_6] : memref<32x32xf32, #tpu.memory_space<vmem>>, vector<32x32xf32>
    %10 = arith.truncf %0 : vector<8x32xf32> to vector<8x32xbf16>
    %c0_7 = arith.constant 0 : index
    %c0_8 = arith.constant 0 : index
    %11 = vector.load %arg3[%c0_7, %c0_8] : memref<32x96xbf16, #tpu.memory_space<vmem>>, vector<32x96xbf16>
    %cst = arith.constant dense<0.000000e+00> : vector<8x96xf32>
    %12 = tpu.matmul %10, %11, %cst {dimension_numbers = #tpu.dot_dimension_numbers<[1], [0], [0], [1], [0, 0, 1, 1], [], []>} : vector<8x32xbf16>, vector<32x96xbf16>, vector<8x96xf32> -> vector<8x96xf32>
    %c0_9 = arith.constant 0 : index
    %c0_10 = arith.constant 0 : index
    %13 = vector.load %arg7[%c0_9, %c0_10] : memref<1x96xf32, #tpu.memory_space<vmem>>, vector<1x96xf32>
    %14 = vector.broadcast %13 : vector<1x96xf32> to vector<8x96xf32>
    %15 = arith.addf %12, %14 : vector<8x96xf32>
    %16 = vector.extract_strided_slice %15 {offsets = [0, 0], sizes = [8, 32], strides = [1, 1]} : vector<8x96xf32> to vector<8x32xf32>
    %17 = vector.extract_strided_slice %15 {offsets = [0, 32], sizes = [8, 32], strides = [1, 1]} : vector<8x96xf32> to vector<8x32xf32>
    %18 = tpu.transpose %17, [1, 0] : vector<8x32xf32> -> vector<32x8xf32>
    %19 = vector.extract_strided_slice %15 {offsets = [0, 64], sizes = [8, 32], strides = [1, 1]} : vector<8x96xf32> to vector<8x32xf32>
    %cst_11 = arith.constant 0.000000e+00 : f32
    %20 = vector.broadcast %cst_11 : f32 to vector<8x32xf32>
    %21 = vector.extract_strided_slice %16 {offsets = [0, 0], sizes = [8, 8], strides = [1, 1]} : vector<8x32xf32> to vector<8x8xf32>
    %22 = arith.truncf %21 : vector<8x8xf32> to vector<8x8xbf16>
    %23 = vector.extract_strided_slice %18 {offsets = [0, 0], sizes = [8, 8], strides = [1, 1]} : vector<32x8xf32> to vector<8x8xf32>
    %24 = arith.truncf %23 : vector<8x8xf32> to vector<8x8xbf16>
    %cst_12 = arith.constant dense<0.000000e+00> : vector<8x8xf32>
    %25 = tpu.matmul %22, %24, %cst_12 {dimension_numbers = #tpu.dot_dimension_numbers<[1], [0], [0], [1], [0, 0, 1, 1], [], []>} : vector<8x8xbf16>, vector<8x8xbf16>, vector<8x8xf32> -> vector<8x8xf32>
    %26 = arith.addf %25, %1 : vector<8x8xf32>
    %cst_13 = arith.constant dense<0xFF800000> : vector<8xf32>
    %27 = vector.multi_reduction <maximumf>, %26, %cst_13 [1] : vector<8x8xf32> to vector<8xf32>
    %28 = vector.shape_cast %27 : vector<8xf32> to vector<8x1xf32>
    %29 = vector.broadcast %28 : vector<8x1xf32> to vector<8x8xf32>
    %30 = arith.subf %26, %29 : vector<8x8xf32>
    %31 = math.exp %30 : vector<8x8xf32>
    %cst_14 = arith.constant dense<0.000000e+00> : vector<8xf32>
    %32 = vector.multi_reduction <add>, %31, %cst_14 [1] : vector<8x8xf32> to vector<8xf32>
    %33 = vector.shape_cast %32 : vector<8xf32> to vector<8x1xf32>
    %34 = tpu.reciprocal %33 {approx = true} : vector<8x1xf32> -> vector<8x1xf32>
    %35 = vector.broadcast %34 : vector<8x1xf32> to vector<8x8xf32>
    %36 = arith.mulf %31, %35 : vector<8x8xf32>
    %37 = arith.truncf %36 : vector<8x8xf32> to vector<8x8xbf16>
    %38 = vector.extract_strided_slice %19 {offsets = [0, 0], sizes = [8, 8], strides = [1, 1]} : vector<8x32xf32> to vector<8x8xf32>
    %39 = arith.truncf %38 : vector<8x8xf32> to vector<8x8xbf16>
    %cst_15 = arith.constant dense<0.000000e+00> : vector<8x8xf32>
    %40 = tpu.matmul %37, %39, %cst_15 {dimension_numbers = #tpu.dot_dimension_numbers<[1], [0], [0], [1], [0, 0, 1, 1], [], []>} : vector<8x8xbf16>, vector<8x8xbf16>, vector<8x8xf32> -> vector<8x8xf32>
    %41 = arith.truncf %40 : vector<8x8xf32> to vector<8x8xbf16>
    %42 = vector.extract_strided_slice %9 {offsets = [0, 0], sizes = [8, 32], strides = [1, 1]} : vector<32x32xf32> to vector<8x32xf32>
    %43 = arith.truncf %42 : vector<8x32xf32> to vector<8x32xbf16>
    %cst_16 = arith.constant dense<0.000000e+00> : vector<8x32xf32>
    %44 = tpu.matmul %41, %43, %cst_16 {dimension_numbers = #tpu.dot_dimension_numbers<[1], [0], [0], [1], [0, 0, 1, 1], [], []>} : vector<8x8xbf16>, vector<8x32xbf16>, vector<8x32xf32> -> vector<8x32xf32>
    %45 = arith.addf %20, %44 : vector<8x32xf32>
    %46 = vector.extract_strided_slice %16 {offsets = [0, 8], sizes = [8, 8], strides = [1, 1]} : vector<8x32xf32> to vector<8x8xf32>
    %47 = arith.truncf %46 : vector<8x8xf32> to vector<8x8xbf16>
    %48 = vector.extract_strided_slice %18 {offsets = [8, 0], sizes = [8, 8], strides = [1, 1]} : vector<32x8xf32> to vector<8x8xf32>
    %49 = arith.truncf %48 : vector<8x8xf32> to vector<8x8xbf16>
    %cst_17 = arith.constant dense<0.000000e+00> : vector<8x8xf32>
    %50 = tpu.matmul %47, %49, %cst_17 {dimension_numbers = #tpu.dot_dimension_numbers<[1], [0], [0], [1], [0, 0, 1, 1], [], []>} : vector<8x8xbf16>, vector<8x8xbf16>, vector<8x8xf32> -> vector<8x8xf32>
    %51 = arith.addf %50, %1 : vector<8x8xf32>
    %cst_18 = arith.constant dense<0xFF800000> : vector<8xf32>
    %52 = vector.multi_reduction <maximumf>, %51, %cst_18 [1] : vector<8x8xf32> to vector<8xf32>
    %53 = vector.shape_cast %52 : vector<8xf32> to vector<8x1xf32>
    %54 = vector.broadcast %53 : vector<8x1xf32> to vector<8x8xf32>
    %55 = arith.subf %51, %54 : vector<8x8xf32>
    %56 = math.exp %55 : vector<8x8xf32>
    %cst_19 = arith.constant dense<0.000000e+00> : vector<8xf32>
    %57 = vector.multi_reduction <add>, %56, %cst_19 [1] : vector<8x8xf32> to vector<8xf32>
    %58 = vector.shape_cast %57 : vector<8xf32> to vector<8x1xf32>
    %59 = tpu.reciprocal %58 {approx = true} : vector<8x1xf32> -> vector<8x1xf32>
    %60 = vector.broadcast %59 : vector<8x1xf32> to vector<8x8xf32>
    %61 = arith.mulf %56, %60 : vector<8x8xf32>
    %62 = arith.truncf %61 : vector<8x8xf32> to vector<8x8xbf16>
    %63 = vector.extract_strided_slice %19 {offsets = [0, 8], sizes = [8, 8], strides = [1, 1]} : vector<8x32xf32> to vector<8x8xf32>
    %64 = arith.truncf %63 : vector<8x8xf32> to vector<8x8xbf16>
    %cst_20 = arith.constant dense<0.000000e+00> : vector<8x8xf32>
    %65 = tpu.matmul %62, %64, %cst_20 {dimension_numbers = #tpu.dot_dimension_numbers<[1], [0], [0], [1], [0, 0, 1, 1], [], []>} : vector<8x8xbf16>, vector<8x8xbf16>, vector<8x8xf32> -> vector<8x8xf32>
    %66 = arith.truncf %65 : vector<8x8xf32> to vector<8x8xbf16>
    %67 = vector.extract_strided_slice %9 {offsets = [8, 0], sizes = [8, 32], strides = [1, 1]} : vector<32x32xf32> to vector<8x32xf32>
    %68 = arith.truncf %67 : vector<8x32xf32> to vector<8x32xbf16>
    %cst_21 = arith.constant dense<0.000000e+00> : vector<8x32xf32>
    %69 = tpu.matmul %66, %68, %cst_21 {dimension_numbers = #tpu.dot_dimension_numbers<[1], [0], [0], [1], [0, 0, 1, 1], [], []>} : vector<8x8xbf16>, vector<8x32xbf16>, vector<8x32xf32> -> vector<8x32xf32>
    %70 = arith.addf %45, %69 : vector<8x32xf32>
    %71 = vector.extract_strided_slice %16 {offsets = [0, 16], sizes = [8, 8], strides = [1, 1]} : vector<8x32xf32> to vector<8x8xf32>
    %72 = arith.truncf %71 : vector<8x8xf32> to vector<8x8xbf16>
    %73 = vector.extract_strided_slice %18 {offsets = [16, 0], sizes = [8, 8], strides = [1, 1]} : vector<32x8xf32> to vector<8x8xf32>
    %74 = arith.truncf %73 : vector<8x8xf32> to vector<8x8xbf16>
    %cst_22 = arith.constant dense<0.000000e+00> : vector<8x8xf32>
    %75 = tpu.matmul %72, %74, %cst_22 {dimension_numbers = #tpu.dot_dimension_numbers<[1], [0], [0], [1], [0, 0, 1, 1], [], []>} : vector<8x8xbf16>, vector<8x8xbf16>, vector<8x8xf32> -> vector<8x8xf32>
    %76 = arith.addf %75, %1 : vector<8x8xf32>
    %cst_23 = arith.constant dense<0xFF800000> : vector<8xf32>
    %77 = vector.multi_reduction <maximumf>, %76, %cst_23 [1] : vector<8x8xf32> to vector<8xf32>
    %78 = vector.shape_cast %77 : vector<8xf32> to vector<8x1xf32>
    %79 = vector.broadcast %78 : vector<8x1xf32> to vector<8x8xf32>
    %80 = arith.subf %76, %79 : vector<8x8xf32>
    %81 = math.exp %80 : vector<8x8xf32>
    %cst_24 = arith.constant dense<0.000000e+00> : vector<8xf32>
    %82 = vector.multi_reduction <add>, %81, %cst_24 [1] : vector<8x8xf32> to vector<8xf32>
    %83 = vector.shape_cast %82 : vector<8xf32> to vector<8x1xf32>
    %84 = tpu.reciprocal %83 {approx = true} : vector<8x1xf32> -> vector<8x1xf32>
    %85 = vector.broadcast %84 : vector<8x1xf32> to vector<8x8xf32>
    %86 = arith.mulf %81, %85 : vector<8x8xf32>
    %87 = arith.truncf %86 : vector<8x8xf32> to vector<8x8xbf16>
    %88 = vector.extract_strided_slice %19 {offsets = [0, 16], sizes = [8, 8], strides = [1, 1]} : vector<8x32xf32> to vector<8x8xf32>
    %89 = arith.truncf %88 : vector<8x8xf32> to vector<8x8xbf16>
    %cst_25 = arith.constant dense<0.000000e+00> : vector<8x8xf32>
    %90 = tpu.matmul %87, %89, %cst_25 {dimension_numbers = #tpu.dot_dimension_numbers<[1], [0], [0], [1], [0, 0, 1, 1], [], []>} : vector<8x8xbf16>, vector<8x8xbf16>, vector<8x8xf32> -> vector<8x8xf32>
    %91 = arith.truncf %90 : vector<8x8xf32> to vector<8x8xbf16>
    %92 = vector.extract_strided_slice %9 {offsets = [16, 0], sizes = [8, 32], strides = [1, 1]} : vector<32x32xf32> to vector<8x32xf32>
    %93 = arith.truncf %92 : vector<8x32xf32> to vector<8x32xbf16>
    %cst_26 = arith.constant dense<0.000000e+00> : vector<8x32xf32>
    %94 = tpu.matmul %91, %93, %cst_26 {dimension_numbers = #tpu.dot_dimension_numbers<[1], [0], [0], [1], [0, 0, 1, 1], [], []>} : vector<8x8xbf16>, vector<8x32xbf16>, vector<8x32xf32> -> vector<8x32xf32>
    %95 = arith.addf %70, %94 : vector<8x32xf32>
    %96 = vector.extract_strided_slice %16 {offsets = [0, 24], sizes = [8, 8], strides = [1, 1]} : vector<8x32xf32> to vector<8x8xf32>
    %97 = arith.truncf %96 : vector<8x8xf32> to vector<8x8xbf16>
    %98 = vector.extract_strided_slice %18 {offsets = [24, 0], sizes = [8, 8], strides = [1, 1]} : vector<32x8xf32> to vector<8x8xf32>
    %99 = arith.truncf %98 : vector<8x8xf32> to vector<8x8xbf16>
    %cst_27 = arith.constant dense<0.000000e+00> : vector<8x8xf32>
    %100 = tpu.matmul %97, %99, %cst_27 {dimension_numbers = #tpu.dot_dimension_numbers<[1], [0], [0], [1], [0, 0, 1, 1], [], []>} : vector<8x8xbf16>, vector<8x8xbf16>, vector<8x8xf32> -> vector<8x8xf32>
    %101 = arith.addf %100, %1 : vector<8x8xf32>
    %cst_28 = arith.constant dense<0xFF800000> : vector<8xf32>
    %102 = vector.multi_reduction <maximumf>, %101, %cst_28 [1] : vector<8x8xf32> to vector<8xf32>
    %103 = vector.shape_cast %102 : vector<8xf32> to vector<8x1xf32>
    %104 = vector.broadcast %103 : vector<8x1xf32> to vector<8x8xf32>
    %105 = arith.subf %101, %104 : vector<8x8xf32>
    %106 = math.exp %105 : vector<8x8xf32>
    %cst_29 = arith.constant dense<0.000000e+00> : vector<8xf32>
    %107 = vector.multi_reduction <add>, %106, %cst_29 [1] : vector<8x8xf32> to vector<8xf32>
    %108 = vector.shape_cast %107 : vector<8xf32> to vector<8x1xf32>
    %109 = tpu.reciprocal %108 {approx = true} : vector<8x1xf32> -> vector<8x1xf32>
    %110 = vector.broadcast %109 : vector<8x1xf32> to vector<8x8xf32>
    %111 = arith.mulf %106, %110 : vector<8x8xf32>
    %112 = arith.truncf %111 : vector<8x8xf32> to vector<8x8xbf16>
    %113 = vector.extract_strided_slice %19 {offsets = [0, 24], sizes = [8, 8], strides = [1, 1]} : vector<8x32xf32> to vector<8x8xf32>
    %114 = arith.truncf %113 : vector<8x8xf32> to vector<8x8xbf16>
    %cst_30 = arith.constant dense<0.000000e+00> : vector<8x8xf32>
    %115 = tpu.matmul %112, %114, %cst_30 {dimension_numbers = #tpu.dot_dimension_numbers<[1], [0], [0], [1], [0, 0, 1, 1], [], []>} : vector<8x8xbf16>, vector<8x8xbf16>, vector<8x8xf32> -> vector<8x8xf32>
    %116 = arith.truncf %115 : vector<8x8xf32> to vector<8x8xbf16>
    %117 = vector.extract_strided_slice %9 {offsets = [24, 0], sizes = [8, 32], strides = [1, 1]} : vector<32x32xf32> to vector<8x32xf32>
    %118 = arith.truncf %117 : vector<8x32xf32> to vector<8x32xbf16>
    %cst_31 = arith.constant dense<0.000000e+00> : vector<8x32xf32>
    %119 = tpu.matmul %116, %118, %cst_31 {dimension_numbers = #tpu.dot_dimension_numbers<[1], [0], [0], [1], [0, 0, 1, 1], [], []>} : vector<8x8xbf16>, vector<8x32xbf16>, vector<8x32xf32> -> vector<8x32xf32>
    %120 = arith.addf %95, %119 : vector<8x32xf32>
    %121 = vector.broadcast %3 : vector<1x32xf32> to vector<8x32xf32>
    %122 = arith.addf %120, %121 : vector<8x32xf32>
    %123 = arith.addf %122, %0 : vector<8x32xf32>
    %cst_32 = arith.constant dense<0.000000e+00> : vector<8xf32>
    %124 = vector.multi_reduction <add>, %123, %cst_32 [1] : vector<8x32xf32> to vector<8xf32>
    %125 = vector.shape_cast %124 : vector<8xf32> to vector<8x1xf32>
    %cst_33 = arith.constant 3.200000e+01 : f32
    %126 = vector.broadcast %cst_33 : f32 to vector<8x1xf32>
    %127 = arith.divf %125, %126 : vector<8x1xf32>
    %128 = vector.broadcast %127 : vector<8x1xf32> to vector<8x32xf32>
    %129 = arith.subf %123, %128 : vector<8x32xf32>
    %130 = arith.mulf %129, %129 : vector<8x32xf32>
    %cst_34 = arith.constant dense<0.000000e+00> : vector<8xf32>
    %131 = vector.multi_reduction <add>, %130, %cst_34 [1] : vector<8x32xf32> to vector<8xf32>
    %132 = vector.shape_cast %131 : vector<8xf32> to vector<8x1xf32>
    %cst_35 = arith.constant 3.200000e+01 : f32
    %133 = vector.broadcast %cst_35 : f32 to vector<8x1xf32>
    %134 = arith.divf %132, %133 : vector<8x1xf32>
    %cst_36 = arith.constant 9.99999996E-13 : f32
    %135 = vector.broadcast %cst_36 : f32 to vector<8x1xf32>
    %136 = arith.addf %134, %135 : vector<8x1xf32>
    %137 = math.rsqrt %136 : vector<8x1xf32>
    %138 = vector.broadcast %137 : vector<8x1xf32> to vector<8x32xf32>
    %139 = arith.mulf %129, %138 : vector<8x32xf32>
    %140 = vector.broadcast %5 : vector<1x32xf32> to vector<8x32xf32>
    %141 = arith.mulf %140, %139 : vector<8x32xf32>
    %142 = vector.broadcast %6 : vector<1x32xf32> to vector<8x32xf32>
    %143 = arith.addf %141, %142 : vector<8x32xf32>
    %144 = arith.truncf %143 : vector<8x32xf32> to vector<8x32xbf16>
    %c0_37 = arith.constant 0 : index
    %c0_38 = arith.constant 0 : index
    %145 = vector.load %arg5[%c0_37, %c0_38] : memref<32x64xbf16, #tpu.memory_space<vmem>>, vector<32x64xbf16>
    %cst_39 = arith.constant dense<0.000000e+00> : vector<8x64xf32>
    %146 = tpu.matmul %144, %145, %cst_39 {dimension_numbers = #tpu.dot_dimension_numbers<[1], [0], [0], [1], [0, 0, 1, 1], [], []>} : vector<8x32xbf16>, vector<32x64xbf16>, vector<8x64xf32> -> vector<8x64xf32>
    %c0_40 = arith.constant 0 : index
    %c0_41 = arith.constant 0 : index
    %147 = vector.load %arg8[%c0_40, %c0_41] : memref<1x64xf32, #tpu.memory_space<vmem>>, vector<1x64xf32>
    %148 = vector.broadcast %147 : vector<1x64xf32> to vector<8x64xf32>
    %149 = arith.addf %146, %148 : vector<8x64xf32>
    %cst_42 = arith.constant 2.000000e+01 : f32
    %150 = vector.broadcast %cst_42 : f32 to vector<8x64xf32>
    %151 = arith.minimumf %149, %150 : vector<8x64xf32>
    %152 = math.exp %151 : vector<8x64xf32>
    %cst_43 = arith.constant 2.000000e+00 : f32
    %153 = vector.broadcast %cst_43 : f32 to vector<8x64xf32>
    %154 = arith.addf %152, %153 : vector<8x64xf32>
    %155 = arith.mulf %152, %154 : vector<8x64xf32>
    %cst_44 = arith.constant 2.000000e+00 : f32
    %156 = vector.broadcast %cst_44 : f32 to vector<8x64xf32>
    %157 = arith.addf %155, %156 : vector<8x64xf32>
    %158 = arith.divf %155, %157 : vector<8x64xf32>
    %cst_45 = arith.constant 2.000000e+01 : f32
    %159 = vector.broadcast %cst_45 : f32 to vector<8x64xf32>
    %160 = arith.cmpf ogt, %149, %159 : vector<8x64xf32>
    %161 = arith.mulf %149, %158 : vector<8x64xf32>
    %162 = arith.select %160, %149, %161 : vector<8x64xi1>, vector<8x64xf32>
    %163 = arith.truncf %162 : vector<8x64xf32> to vector<8x64xbf16>
    %c0_46 = arith.constant 0 : index
    %c0_47 = arith.constant 0 : index
    %164 = vector.load %arg6[%c0_46, %c0_47] : memref<64x32xbf16, #tpu.memory_space<vmem>>, vector<64x32xbf16>
    %cst_48 = arith.constant dense<0.000000e+00> : vector<8x32xf32>
    %165 = tpu.matmul %163, %164, %cst_48 {dimension_numbers = #tpu.dot_dimension_numbers<[1], [0], [0], [1], [0, 0, 1, 1], [], []>} : vector<8x64xbf16>, vector<64x32xbf16>, vector<8x32xf32> -> vector<8x32xf32>
    %166 = vector.broadcast %4 : vector<1x32xf32> to vector<8x32xf32>
    %167 = arith.addf %165, %166 : vector<8x32xf32>
    %168 = arith.addf %167, %143 : vector<8x32xf32>
    %cst_49 = arith.constant dense<0.000000e+00> : vector<8xf32>
    %169 = vector.multi_reduction <add>, %168, %cst_49 [1] : vector<8x32xf32> to vector<8xf32>
    %170 = vector.shape_cast %169 : vector<8xf32> to vector<8x1xf32>
    %cst_50 = arith.constant 3.200000e+01 : f32
    %171 = vector.broadcast %cst_50 : f32 to vector<8x1xf32>
    %172 = arith.divf %170, %171 : vector<8x1xf32>
    %173 = vector.broadcast %172 : vector<8x1xf32> to vector<8x32xf32>
    %174 = arith.subf %168, %173 : vector<8x32xf32>
    %175 = arith.mulf %174, %174 : vector<8x32xf32>
    %cst_51 = arith.constant dense<0.000000e+00> : vector<8xf32>
    %176 = vector.multi_reduction <add>, %175, %cst_51 [1] : vector<8x32xf32> to vector<8xf32>
    %177 = vector.shape_cast %176 : vector<8xf32> to vector<8x1xf32>
    %cst_52 = arith.constant 3.200000e+01 : f32
    %178 = vector.broadcast %cst_52 : f32 to vector<8x1xf32>
    %179 = arith.divf %177, %178 : vector<8x1xf32>
    %cst_53 = arith.constant 9.99999996E-13 : f32
    %180 = vector.broadcast %cst_53 : f32 to vector<8x1xf32>
    %181 = arith.addf %179, %180 : vector<8x1xf32>
    %182 = math.rsqrt %181 : vector<8x1xf32>
    %183 = vector.broadcast %182 : vector<8x1xf32> to vector<8x32xf32>
    %184 = arith.mulf %174, %183 : vector<8x32xf32>
    %185 = vector.broadcast %7 : vector<1x32xf32> to vector<8x32xf32>
    %186 = arith.mulf %185, %184 : vector<8x32xf32>
    %187 = vector.broadcast %8 : vector<1x32xf32> to vector<8x32xf32>
    %188 = arith.addf %186, %187 : vector<8x32xf32>
    %c0_54 = arith.constant 0 : index
    %c0_55 = arith.constant 0 : index
    %189 = vector.load %arg10[%c0_54, %c0_55] : memref<8x32xf32, #tpu.memory_space<vmem>>, vector<8x32xf32>
    tpu.vector_store %arg10[%c0_54, %c0_55], %188 {strides = array<i32>} : memref<8x32xf32, #tpu.memory_space<vmem>>, vector<8x32xf32>,
    return
  }
  func.func @transform_0(%arg0: i32) -> (i32, i32) {
    %c0_i32 = arith.constant 0 : i32
    %c0_i32_0 = arith.constant 0 : i32
    return %arg0, %c0_i32 : i32, i32
  }
  func.func @transform_1(%arg0: i32) -> (i32, i32) {
    %c0_i32 = arith.constant 0 : i32
    %c0_i32_0 = arith.constant 0 : i32
    return %arg0, %c0_i32 : i32, i32
  }
  func.func @transform_2(%arg0: i32) -> (i32, i32) {
    %c0_i32 = arith.constant 0 : i32
    %c0_i32_0 = arith.constant 0 : i32
    %c0_i32_1 = arith.constant 0 : i32
    return %c0_i32, %c0_i32_0 : i32, i32
  }
  func.func @transform_3(%arg0: i32) -> (i32, i32) {
    %c0_i32 = arith.constant 0 : i32
    %c0_i32_0 = arith.constant 0 : i32
    %c0_i32_1 = arith.constant 0 : i32
    return %c0_i32, %c0_i32_0 : i32, i32
  }
  func.func @transform_4(%arg0: i32) -> (i32, i32) {
    %c0_i32 = arith.constant 0 : i32
    %c0_i32_0 = arith.constant 0 : i32
    %c0_i32_1 = arith.constant 0 : i32
    return %c0_i32, %c0_i32_0 : i32, i32
  }
  func.func @transform_5(%arg0: i32) -> (i32, i32) {
    %c0_i32 = arith.constant 0 : i32
    %c0_i32_0 = arith.constant 0 : i32
    %c0_i32_1 = arith.constant 0 : i32
    return %c0_i32, %c0_i32_0 : i32, i32
  }
  func.func @transform_6(%arg0: i32) -> (i32, i32) {
    %c0_i32 = arith.constant 0 : i32
    %c0_i32_0 = arith.constant 0 : i32
    %c0_i32_1 = arith.constant 0 : i32
    return %c0_i32, %c0_i32_0 : i32, i32
  }
  func.func @transform_7(%arg0: i32) -> (i32, i32) {
    %c0_i32 = arith.constant 0 : i32
    %c0_i32_0 = arith.constant 0 : i32
    %c0_i32_1 = arith.constant 0 : i32
    return %c0_i32, %c0_i32_0 : i32, i32
  }
  func.func @transform_8(%arg0: i32) -> (i32, i32) {
    %c0_i32 = arith.constant 0 : i32
    %c0_i32_0 = arith.constant 0 : i32
    %c0_i32_1 = arith.constant 0 : i32
    return %c0_i32, %c0_i32_0 : i32, i32
  }
  func.func @transform_9(%arg0: i32) -> (i32, i32) {
    %c0_i32 = arith.constant 0 : i32
    %c0_i32_0 = arith.constant 0 : i32
    return %arg0, %c0_i32 : i32, i32
  }
}

</mosaic_0001>

<bundles_post_ra>
// kernel: tpu_custom_call.1
= control target key start
LH: loop header
LB: loop body
LE: loop exit
PB: predicated region body
PF: predicated region fallthrough
CT: control target
= control target key end

     0   :  { %14 = vsyncpa [#allocation3], 0  ;;  %s2214_s0 = inlined_call_operand.vmem [shape: f32[16,32], index: 0, kind: input, shape index: {}]   ;;  %s2215_s1 = inlined_call_operand.vmem [shape: f32[16,8], index: 1, kind: input, shape index: {}]   ;;  %s2216_s2 = inlined_call_operand.hbm [shape: bf16[32,96], index: 2, kind: input, shape index: {}]   ;;  %s2217_s3 = inlined_call_operand.vmem [shape: f32[32,32], index: 3, kind: input, shape index: {}]   ;;  %s2218_s4 = inlined_call_operand.hbm [shape: bf16[32,64], index: 4, kind: input, shape index: {}]   ;;  %s2219_s5 = inlined_call_operand.vmem [shape: bf16[64,32], index: 5, kind: input, shape index: {}]   ;;  %s2220_s6 = inlined_call_operand.vmem [shape: f32[1,96], index: 6, kind: input, shape index: {}]   ;;  %s2221_s7 = inlined_call_operand.vmem [shape: f32[1,64], index: 7, kind: input, shape index: {}]   ;;  %s2222_s8 = inlined_call_operand.vmem [shape: f32[8,32], index: 8, kind: input, shape index: {}]   ;;  %s2223_s9 = inlined_call_operand.hbm [shape: f32[16,32], index: 9, kind: output, shape index: {}]  }
   0x1   :  { %15 = vsyncpa [#allocation6], 0 }
   0x2   :  { %16 = vsyncpa [#allocation4], 0 }
   0x3   :  { %18 = vsyncpa [#allocation4 + $0x1], 0  ;;  %s1906_s30 = smov 0   ;;  %s1908_s10 = smov 0  }
   0x4   :  { %s1910_s11 = smov 0   ;;  %s1912_s12 = smov 0  }
   0x5 LB: > { %s1927_s13 = sadd.s32 4294967295, %s1839_s12   ;;  %s1440_s14 = sadd.s32 4294967294, %s1839_s12   ;;  %s1839_s12 = sphi %s1912_s12, %s2237_s12   ;;  %s1835_s11 = sphi %s1910_s11, %s2236_s11   ;;  %s1831_s10 = sphi %s1908_s10, %s2235_s10   ;;  %s1827_s30 = sphi %s1906_s30, %s2234_s30  }
   0x6   : > { %s1931_s15 = sadd.s32 1, %s1839_s12   ;;  %s230_s16 = sadd.s32 1, %s1835_s11 }
   0x7   : > { %s227_s17 = ssub.s32 %s1839_s12, %s1931_s15  ;;  %p240_p0 = scmp.ne.s32.totalorder %s1835_s11, %s1831_s10 }
   0x8   : > { %p228_p1 = scmp.eq.s32.totalorder %s227_s17, 0  ;;  %p241_p2 = scmp.eq.s32.totalorder %s1927_s13, 1 }
   0x9   : > { %p246_p3 = scmp.ne.s32.totalorder %s1831_s10, %s1827_s30  ;;  %p247_p4 = scmp.eq.s32.totalorder %s1440_s14, 1 }
   0xa   : > { %s1942_s18 = scalar_select %p228_p1, %s1835_s11, %s230_s16  }
   0xb   : > { %p1944_p5 = por %p241_p2, %p240_p0  ;;  %p1948_p6 = por %p247_p4, %p246_p3 }
   0xc   : > { %p1441_p7 = scmp.ge.s32.totalorder %s1839_s12, 1  ;;  %p254_p8 = scmp.lt.s32.totalorder %s1839_s12, 3 }
   0xd   : > { %s2226_s20 = scalar_select %p1948_p6, 1, 0 }
   0xe   : > { %p2224_p9 = scmp.eq.s32.totalorder %s1927_s13, 0  ;;  %p1955_p10 = pnand %p1441_p7, %p254_p8 }
   0xf   : > { %s1841_s22 = smov [#allocation2]   ;;  %s1842_s25 = smov [#allocation5]  }
  0x10   : > { %s266_s23 = sshll.u32 %s1841_s22, 4  ;;  %p1625_p11 = pneg %p1955_p10  ;;  %s267_s23 = int_to_ptr.vmem [resolvable:$true] %s266_s23 }
  0x11   : > { %s282_s26 = sshll.u32 %s1842_s25, 4  ;;  %s1730_s27 = scalar_lea.vmem %s267_s23, 256  ;;  %s283_s26 = int_to_ptr.vmem [resolvable:$true] %s282_s26 }
  0x12   : > { %p1963_p12 = pnand %p2224_p9, %p1625_p11  ;;  %p1731_p0 = scmp.ne.s32.totalorder %s267_s23, %s1730_s27 }
  0x13   : > { %p1738_p3 = scmp.lt.s32.totalorder %s267_s23, %s267_s23  ;;  %p1739_p4 = scmp.lt.s32.totalorder %s1730_s27, %s1730_s27 }
  0x14   : > { %p1721_p13 = pneg %p1963_p12 }
  0x15   : > { %p1740_p7 = por %p1739_p4, %p1738_p3 }
  0x16   : > { %p1733_p1 = pnand %p1731_p0, %p1721_p13 }
  0x18   : > { %p1734_p2 = pneg %p1733_p1 }
  0x1a   : > { %p1741_p8 = pnand %p1740_p7, %p1734_p2 }
  0x1c   : > { %1744 = shalt.err (!%p1741_p8)
}
  0x1d   : > { %s1843_s28 = smov 64   ;;  %s1844_s29 = smov 4  }
  0x1e   : > { %1628 = dma.hbm_to_vmem [thread:$0]  (!%p1963_p12), %s2216_s2, 256, %s267_s23, [#allocation3], %s1843_s28, %s1843_s28, %s1844_s29  }
  0x1f   : > { %s1756_s17 = scalar_lea.vmem %s283_s26, 256  ;;  %p1764_p9 = scmp.lt.s32.totalorder %s283_s26, %s283_s26 }
  0x20   : > { %p1757_p11 = scmp.ne.s32.totalorder %s283_s26, %s1756_s17  ;;  %p1765_p6 = scmp.lt.s32.totalorder %s1756_s17, %s1756_s17 }
  0x22   : > { %p1759_p0 = pnand %p1757_p11, %p1721_p13  ;;  %p1766_p3 = por %p1765_p6, %p1764_p9 }
  0x24   : > { %p1760_p1 = pneg %p1759_p0 }
  0x26   : > { %p1767_p2 = pnand %p1766_p3, %p1760_p1 }
  0x28   : > { %1770 = shalt.err (!%p1767_p2)
}
  0x29   : > { %1631 = dma.hbm_to_vmem [thread:$0]  (!%p1963_p12), %s2218_s4, 256, %s283_s26, [#allocation6], %s1843_s28, %s1843_s28, %s1844_s29  }
  0x2a   : > { %324 = sbr.rel (%p1955_p10) target bundleno = 3710 (0xe7e), region = 56  ;;  %p2229_p4 = scmp.eq.s32.totalorder (!%p1955_p10), %s1927_s13, 0 }
  0x2f   : > { %1814 = dma.done.wait (%p2229_p4), [#allocation3], 256   ;;  %p2230_p13 = pmov %p2229_p4 }
  0x30   : > { %p2231_p7 = pmov %p2229_p4 }
  0x31   : > { %1816 = vsyncadd (%p2230_p13), [#allocation3], 4294967040 }
  0x32   : > { %1818 = dma.done.wait (%p2231_p7), [#allocation6], 256   ;;  %p2232_p6 = pmov %p2229_p4 }
  0x33   : > { %p367_p9 = scmp.lt.s32.totalorder %s1927_s13, 1  ;;  %v1845_v0 = vmov 0.0   ;;  %vm1846_vm0 = vmmov 0   ;;  %v1687_v1 = vld [vmem:[#allocation2 + $0x8] sm:$0xff]   ;;  %v1688_v2 = vld [vmem:[#allocation2] sm:$0xff]   ;;  %vm407_vm1 = vcmask 261120  }
  0x34   : > { %1820 = vsyncadd (%p2232_p6), [#allocation6], 4294967040  ;;  %1515 = vmatprep.subr.bf16.mxu0 %v1845_v0  ;;  %1519 = vmatprep.mubr.msk.bf16.mxu0 %vm1846_vm0, %v1845_v0  ;;  %v1451_v5 = vld [vmem:[%s2220_s6] ss:$0 sm:$0xff]  ;;  %s1847_s14 = smov 96   ;;  %s1848_s16 = smov 120  }
  0x35   : > { %s2000_s21 = scalar_select %p367_p9, %s1927_s13, 1  ;;  %1529 = vmatprep.subr.bf16.mxu1 %v1845_v0  ;;  %1531 = vmatprep.mubr.msk.bf16.mxu1 %vm1846_vm0, %v1845_v0  ;;  %vm493_vm2 = vcmask 1043456   ;;  %vm489_vm3 = vcmask 64512   ;;  %v379_v57 = vld [vmem:[%s2217_s3] sm:$0xff]  ;;  %v380_v60 = vld [vmem:[%s2217_s3 + $0x8] sm:$0xff]  ;;  %vm1264_vm5 = vcmask 523264  }
  0x36   : > { %1516 = vmatpush3.bf16.msra.mxu0 %v1687_v1  ;;  %s1851_s24 = smov 112   ;;  %v599_v58 = vpack.c.bf16 %v379_v57, %v379_v57  ;;  %v710_v61 = vpack.c.bf16 %v380_v60, %v380_v60 }
  0x37   : > { %s1449_s23 = sshll.u32 %s2000_s21, 3  ;;  %1517 = vmatprep.subr.bf16.mxu0 %v1845_v0  ;;  %s1849_s21 = smov 56  }
  0x38   : > { %s370_s27 = scalar_lea.vmem %s2214_s0, %s1449_s23  ;;  %s374_s25 = scalar_lea.vmem %s2215_s1, %s1449_s23  ;;  %v761_v59 = vsel %vm493_vm2, %v599_v58, 0  ;;  %v715_v62 = vsel %vm493_vm2, %v710_v61, 0 }
  0x39   : > { %v2011_v3 = vld [vmem:[%s370_s27] sm:$0xff]  ;;  %s1850_s23 = smov 64   ;;  %s1477_s27 = sshll.u32 %s1927_s13, 7 }
  0x3a   : > { %v383_v4 = vpack.c.bf16 %v2011_v3, %v2011_v3  ;;  %1518 = vmatpush3.bf16.msra.mxu0 %v1688_v2  ;;  %v2042_v20 = vld [vmem:[%s374_s25] sm:$0xff]  ;;  %s1854_s25 = smov 40   ;;  %s1345_s17 = scalar_lea.hbm %s2223_s9, %s1477_s27 }
  0x3b   : > { %1523 = vmatprep.subr.bf16.mxu0 %v1845_v0 }
  0x3d   : > { %1520 = vmatmul.mubr.msk.bf16.vlgmr.msra.gmra.mxu0 %vm407_vm1, %v383_v4 }
  0x3e   : > { %1525 = vmatprep.mubr.msk.bf16.mxu0 %vm1846_vm0, %v1845_v0 }
  0xfd   : > { %v445_v6 = vpop.f32.mrf.mxu0 }
  0xfe   : > { %v446_v7 = vadd.f32 %v1451_v5, %v445_v6 }
  0xff   : > { %v1521_v8 = vpop.f32.mrf.mxu0 }
 0x100   : > { %452 = vrot.lane.b32.xlu0 %v446_v7, %s1847_s14  ;;  %v2023_v10 = vpack.c.bf16 %v446_v7, %v446_v7  ;;  %s1852_s14 = smov 104  }
 0x101   : > { %v448_v9 = vpop.f32.mrf.mxu0 }
 0x103   : > { %v1522_v11 = vpop.f32.mrf.mxu0 }
 0x104   : > { %601 = vrot.lane.b32.xlu0 %v2023_v10, %s1848_s16  ;;  %s1853_s16 = smov 48  }
 0x172   : > { %v453_v12 = vpop.permute.xlu0 %452 }
 0x173   : > { %455 = vxpose.xlu1.b32.start.end [1/1] (short) (narrow) %v453_v12, 32 }
 0x176   : > { %v602_v19 = vpop.permute.xlu0 %601 }
 0x1ef   : > { %v471_v13 = vpop.trf.xlu1 }
 0x1f0   : > { %v488_v14 = vpack.c.bf16 %v471_v13, %v471_v13 }
 0x1f2   : > { %v495_v15 = vsel %vm493_vm2, %v488_v14, 0 }
 0x1f3   : > { %1524 = vmatpush3.bf16.msra.mxu0 %v495_v15  ;;  %v472_v16 = vpop.trf.xlu1 }
 0x1f4   : > { %v600_v17 = vpack.c.bf16 %v472_v16, %v472_v16  ;;  %1535 = vmatprep.subr.bf16.mxu0 %v1845_v0 }
 0x1f6   : > { %1526 = vmatmul.mubr.msk.bf16.vlgmr.msra.gmra.mxu0 %vm489_vm3, %v2023_v10  ;;  %v607_v18 = vsel %vm493_vm2, %v600_v17, 0 }
 0x1f7   : > { %1536 = vmatpush3.bf16.msra.mxu0 %v607_v18  ;;  %1537 = vmatprep.mubr.msk.bf16.mxu0 %vm1846_vm0, %v1845_v0  ;;  %v2049_v33 = vpop.trf.xlu1 }
 0x1f8   : > { %1547 = vmatprep.subr.bf16.mxu0 %v1845_v0  ;;  %v803_v6 = vpack.c.bf16 %v2049_v33, %v2049_v33 }
 0x1fa   : > { %v810_v11 = vsel %vm493_vm2, %v803_v6, 0 }
 0x1fb   : > { %v2051_v34 = vpop.trf.xlu1 }
 0x1fe   : > { %1538 = vmatmul.mubr.msk.bf16.vlgmr.msra.gmra.mxu0 %vm489_vm3, %v602_v19 }
 0x1ff   : > { %1549 = vmatprep.mubr.msk.bf16.mxu0 %vm1846_vm0, %v1845_v0  ;;  %1548 = vmatpush3.bf16.msra.mxu0 %v715_v62 }
 0x200   : > { %1559 = vmatprep.subr.bf16.mxu0 %v1845_v0 }
 0x2b6   : > { %v531_v21 = vpop.f32.mrf.mxu0 }
 0x2b7   : > { %v532_v22 = vadd.f32 %v531_v21, %v2042_v20 }
 0x2b8   : > { %v1527_v23 = vpop.f32.mrf.mxu0 }
 0x2b9   : > { %v537_v24 = vsel %vm489_vm3, %v532_v22, -inf }
 0x2ba   : > { %538 = vmax.xlane.f32.xlu1 %v537_v24  ;;  %v534_v25 = vpop.f32.mrf.mxu0 }
 0x2bc   : > { %v1528_v26 = vpop.f32.mrf.mxu0 }
 0x2be   : > { %v643_v27 = vpop.f32.mrf.mxu0 }
 0x2bf   : > { %v644_v28 = vadd.f32 %v643_v27, %v2042_v20 }
 0x2c0   : > { %v1539_v29 = vpop.f32.mrf.mxu0 }
 0x2c1   : > { %v649_v30 = vsel %vm489_vm3, %v644_v28, -inf }
 0x2c2   : > { %650 = vmax.xlane.f32.xlu0 %v649_v30  ;;  %v646_v31 = vpop.f32.mrf.mxu0 }
 0x2c4   : > { %v1540_v32 = vpop.f32.mrf.mxu0 }
 0x2cb   : > { %661 = vrot.lane.b32.xlu1 %v2023_v10, %s1849_s21  ;;  %s1855_s21 = smov [#allocation7]  }
 0x343   : > { %v539_v35 = vpop.xlane.xlu1 %538 }
 0x344   : > { %v540_v36 = vsub.f32 %v532_v22, %v539_v35 }
 0x346   : > { %v541_v37 = vmul.f32 1.442695, %v540_v36 }
 0x347   : > { %v662_v51 = vpop.permute.xlu1 %661 }
 0x348   : > { %1695 = vpow2.f32 %v541_v37  ;;  %v667_v53 = vsel %vm493_vm2, %v662_v51, 0 }
 0x34b   : > { %v651_v38 = vpop.xlane.xlu0 %650 }
 0x34c   : > { %v652_v39 = vsub.f32 %v644_v28, %v651_v38 }
 0x34e   : > { %v653_v40 = vmul.f32 1.442695, %v652_v39 }
 0x350   : > { %1697 = vpow2.f32 %v653_v40 }
 0x355   : > { %v1696_v41 = vpop.eup %1695 }
 0x356   : > { %v543_v42 = vsel %vm489_vm3, %v1696_v41, 0.0 }
 0x357   : > { %544 = vadd.xlane.f32.xlu0 %v543_v42 }
 0x35d   : > { %v1698_v43 = vpop.eup %1697 }
 0x35e   : > { %v655_v44 = vsel %vm489_vm3, %v1698_v43, 0.0 }
 0x35f   : > { %656 = vadd.xlane.f32.xlu0 %v655_v44 }
 0x375   : > { %550 = vrot.lane.b32.xlu0 %v2023_v10, %s1850_s23  ;;  %s1775_s23 = sshll.u32 %s1855_s21, 4  ;;  %s1776_s23 = int_to_ptr.vmem [resolvable:$false] %s1775_s23 }
 0x376   : > { %s1777_s13 = scalar_lea.vmem %s1776_s23, 256 }
 0x379   : > { %804 = vrot.lane.b32.xlu0 %v2023_v10, %s1851_s24  ;;  %s364_s24 = sand.u32 1, %s1831_s10  }
 0x37a   : > { %s1448_s26 = sshll.u32 %s364_s24, 3  ;;  %s1334_s22 = scalar_lea.sflag [#allocation4], %s364_s24 }
 0x37b   : > { %s366_s28 = scalar_lea.vmem [#allocation7], %s1448_s26 }
 0x37c   : > { %s1347_s29 = sshll.u32 %s366_s28, 4  ;;  %s1348_s29 = int_to_ptr.vmem [resolvable:$true] %s1347_s29 }
 0x37d   : > { %p1778_p11 = scmp.lt.s32.totalorder %s1348_s29, %s1776_s23 }
 0x3e0   : > { %v545_v45 = vpop.xlane.xlu0 %544 }
 0x3e1   : > { %1699 = vrcp.f32 %v545_v45 }
 0x3e8   : > { %v657_v46 = vpop.xlane.xlu0 %656 }
 0x3e9   : > { %1701 = vrcp.f32 %v657_v46 }
 0x3ec   : > { %v551_v47 = vpop.permute.xlu0 %550 }
 0x3ed   : > { %v556_v48 = vsel %vm493_vm2, %v551_v47, 0 }
 0x3ee   : > { %v1700_v49 = vpop.eup %1699  ;;  %1530 = vmatpush3.bf16.msra.mxu1 %v556_v48 }
 0x3ef   : > { %1541 = vmatprep.subr.bf16.mxu1 %v1845_v0  ;;  %v547_v50 = vmul.f32 %v1700_v49, %v1696_v41  ;;  %v961_v41 = vpack.c.bf16 %v2051_v34, %v2051_v34  ;;  %v381_v34 = vld [vmem:[%s2217_s3 + $0x10] sm:$0xff] }
 0x3f0   : > { %v805_v14 = vpop.permute.xlu0 %804  ;;  %v913_v46 = vpack.c.bf16 %v381_v34, %v381_v34 }
 0x3f1   : > { %v548_v52 = vpack.c.bf16 %v547_v50, %v547_v50  ;;  %v968_v44 = vsel %vm493_vm2, %v961_v41, 0  ;;  %v1690_v41 = vld [vmem:[#allocation5] sm:$0xff]  }
 0x3f2   : > { %v918_v47 = vsel %vm493_vm2, %v913_v46, 0 }
 0x3f3   : > { %1532 = vmatmul.mubr.msk.bf16.vlgmr.msra.gmra.mxu1 %vm489_vm3, %v548_v52 }
 0x3f4   : > { %1542 = vmatpush3.bf16.msra.mxu1 %v667_v53  ;;  %1543 = vmatprep.mubr.msk.bf16.mxu1 %vm1846_vm0, %v1845_v0 }
 0x3f5   : > { %1553 = vmatprep.subr.bf16.mxu1 %v1845_v0 }
 0x3f6   : > { %v1702_v54 = vpop.eup %1701 }
 0x3f7   : > { %v659_v55 = vmul.f32 %v1702_v54, %v1698_v43 }
 0x3f9   : > { %v660_v56 = vpack.c.bf16 %v659_v55, %v659_v55 }
 0x3fb   : > { %1544 = vmatmul.mubr.msk.bf16.vlgmr.msra.gmra.mxu1 %vm489_vm3, %v660_v56 }
 0x3fc   : > { %1555 = vmatprep.mubr.msk.bf16.mxu1 %vm1846_vm0, %v1845_v0  ;;  %1554 = vmatpush3.bf16.msra.mxu1 %v761_v59 }
 0x3fd   : > { %1565 = vmatprep.subr.bf16.mxu1 %v1845_v0 }
 0x4b3   : > { %v592_v63 = vpop.f32.mrf.mxu1 }
 0x4b4   : > { %v598_v1 = vpack.c.bf16 %v592_v63, %v592_v63 }
 0x4b5   : > { %v1533_v2 = vpop.f32.mrf.mxu1 }
 0x4b6   : > { %1556 = vmatmul.mubr.msk.bf16.vlgmr.msra.gmra.mxu1 %vm489_vm3, %v598_v1 }
 0x4b7   : > { %v595_v4 = vpop.f32.mrf.mxu1  ;;  %1567 = vmatprep.mubr.msk.bf16.mxu1 %vm1846_vm0, %v1845_v0 }
 0x4b9   : > { %v1534_v5 = vpop.f32.mrf.mxu1 }
 0x4bb   : > { %v703_v7 = vpop.f32.mrf.mxu1 }
 0x4bc   : > { %v709_v8 = vpack.c.bf16 %v703_v7, %v703_v7 }
 0x4bd   : > { %v1545_v9 = vpop.f32.mrf.mxu1 }
 0x4be   : > { %1550 = vmatmul.mubr.msk.bf16.vlgmr.msra.gmra.mxu0 %vm489_vm3, %v709_v8 }
 0x4bf   : > { %1560 = vmatpush3.bf16.msra.mxu0 %v810_v11  ;;  %v706_v12 = vpop.f32.mrf.mxu1  ;;  %1561 = vmatprep.mubr.msk.bf16.mxu0 %vm1846_vm0, %v1845_v0 }
 0x4c0   : > { %1571 = vmatprep.subr.bf16.mxu0 %v1845_v0 }
 0x4c1   : > { %v1546_v13 = vpop.f32.mrf.mxu1 }
 0x4c6   : > { %1562 = vmatmul.mubr.msk.bf16.vlgmr.msra.gmra.mxu0 %vm489_vm3, %v805_v14 }
 0x4c7   : > { %1573 = vmatprep.mubr.msk.bf16.mxu0 %vm1846_vm0, %v1845_v0  ;;  %1572 = vmatpush3.bf16.msra.mxu0 %v918_v47 }
 0x4c8   : > { %1583 = vmatprep.subr.bf16.mxu0 %v1845_v0 }
 0x576   : > { %v797_v15 = vpop.f32.mrf.mxu1 }
 0x578   : > { %v1557_v16 = vpop.f32.mrf.mxu1 }
 0x57a   : > { %v800_v17 = vpop.f32.mrf.mxu1 }
 0x57c   : > { %v1558_v18 = vpop.f32.mrf.mxu1 }
 0x57e   : > { %v751_v19 = vpop.f32.mrf.mxu0 }
 0x57f   : > { %v2090_v21 = vadd.f32 %v797_v15, %v751_v19 }
 0x580   : > { %v1551_v22 = vpop.f32.mrf.mxu0 }
 0x582   : > { %v754_v23 = vpop.f32.mrf.mxu0 }
 0x584   : > { %v1552_v24 = vpop.f32.mrf.mxu0 }
 0x585   : > { %v2141_v24 = vld [vmem:[%s2222_s8] sm:$0xff] }
 0x586   : > { %v846_v25 = vpop.f32.mrf.mxu0 }
 0x587   : > { %v847_v26 = vadd.f32 %v846_v25, %v2042_v20 }
 0x588   : > { %v1563_v27 = vpop.f32.mrf.mxu0 }
 0x589   : > { %v852_v28 = vsel %vm489_vm3, %v847_v26, -inf }
 0x58a   : > { %853 = vmax.xlane.f32.xlu1 %v852_v28  ;;  %v849_v29 = vpop.f32.mrf.mxu0 }
 0x58c   : > { %v1564_v30 = vpop.f32.mrf.mxu0 }
 0x59b   : > { %962 = vrot.lane.b32.xlu1 %v2023_v10, %s1852_s14 }
 0x613   : > { %v854_v31 = vpop.xlane.xlu1 %853 }
 0x614   : > { %v855_v32 = vsub.f32 %v847_v26, %v854_v31 }
 0x616   : > { %v856_v33 = vmul.f32 1.442695, %v855_v32 }
 0x617   : > { %v963_v45 = vpop.permute.xlu1 %962 }
 0x618   : > { %1703 = vpow2.f32 %v856_v33 }
 0x625   : > { %v1704_v35 = vpop.eup %1703 }
 0x626   : > { %v858_v36 = vsel %vm489_vm3, %v1704_v35, 0.0 }
 0x627   : > { %859 = vadd.xlane.f32.xlu0 %v858_v36 }
 0x63d   : > { %864 = vrot.lane.b32.xlu0 %v2023_v10, %s1853_s16 }
 0x6b0   : > { %v860_v37 = vpop.xlane.xlu0 %859 }
 0x6b1   : > { %1705 = vrcp.f32 %v860_v37 }
 0x6b4   : > { %v865_v38 = vpop.permute.xlu0 %864 }
 0x6b5   : > { %v870_v39 = vsel %vm493_vm2, %v865_v38, 0 }
 0x6b6   : > { %1566 = vmatpush3.bf16.msra.mxu1 %v870_v39 }
 0x6b7   : > { %1577 = vmatprep.subr.bf16.mxu1 %v1845_v0 }
 0x6be   : > { %v1706_v40 = vpop.eup %1705 }
 0x6bf   : > { %v862_v42 = vmul.f32 %v1706_v40, %v1704_v35  ;;  %v1689_v40 = vld [vmem:[#allocation5 + $0x8] sm:$0xff]  }
 0x6c1   : > { %v863_v43 = vpack.c.bf16 %v862_v42, %v862_v42 }
 0x6c3   : > { %1568 = vmatmul.mubr.msk.bf16.vlgmr.msra.gmra.mxu1 %vm489_vm3, %v863_v43 }
 0x6c4   : > { %1578 = vmatpush3.bf16.msra.mxu1 %v968_v44  ;;  %1579 = vmatprep.mubr.msk.bf16.mxu1 %vm1846_vm0, %v1845_v0 }
 0x6c5   : > { %1589 = vmatprep.subr.bf16.mxu1 %v1845_v0 }
 0x6cb   : > { %1580 = vmatmul.mubr.msk.bf16.vlgmr.msra.gmra.mxu1 %vm489_vm3, %v963_v45 }
 0x6cc   : > { %1591 = vmatprep.mubr.msk.bf16.mxu1 %vm1846_vm0, %v1845_v0 }
 0x783   : > { %v906_v48 = vpop.f32.mrf.mxu1 }
 0x784   : > { %v912_v49 = vpack.c.bf16 %v906_v48, %v906_v48 }
 0x785   : > { %v1569_v50 = vpop.f32.mrf.mxu1 }
 0x786   : > { %1574 = vmatmul.mubr.msk.bf16.vlgmr.msra.gmra.mxu0 %vm489_vm3, %v912_v49 }
 0x787   : > { %v909_v51 = vpop.f32.mrf.mxu1  ;;  %1585 = vmatprep.mubr.msk.bf16.mxu0 %vm1846_vm0, %v1845_v0 }
 0x789   : > { %v1570_v52 = vpop.f32.mrf.mxu1 }
 0x78a   : > { %v1691_v52 = vld [vmem:[%s2219_s5 + $0x18] sm:$0xff]  }
 0x78b   : > { %v1004_v53 = vpop.f32.mrf.mxu1 }
 0x78c   : > { %v1005_v54 = vadd.f32 %v1004_v53, %v2042_v20  ;;  %v1692_v53 = vld [vmem:[%s2219_s5 + $0x10] sm:$0xff]  }
 0x78d   : > { %v1581_v55 = vpop.f32.mrf.mxu1 }
 0x78e   : > { %v1010_v56 = vsel %vm489_vm3, %v1005_v54, -inf  ;;  %v1694_v55 = vld [vmem:[%s2219_s5] sm:$0xff]  }
 0x78f   : > { %1011 = vmax.xlane.f32.xlu1 %v1010_v56  ;;  %v1007_v57 = vpop.f32.mrf.mxu1  ;;  %v1467_v56 = vld [vmem:[%s2221_s7] ss:$0 sm:$0xff] }
 0x791   : > { %v1582_v58 = vpop.f32.mrf.mxu1 }
 0x818   : > { %v1012_v59 = vpop.xlane.xlu1 %1011 }
 0x819   : > { %v1013_v60 = vsub.f32 %v1005_v54, %v1012_v59  ;;  %v1693_v54 = vld [vmem:[%s2219_s5 + $0x8] sm:$0xff]  }
 0x81b   : > { %v1014_v61 = vmul.f32 1.442695, %v1013_v60 }
 0x81d   : > { %1707 = vpow2.f32 %v1014_v61 }
 0x82a   : > { %v1708_v62 = vpop.eup %1707 }
 0x82b   : > { %v1016_v63 = vsel %vm489_vm3, %v1708_v62, 0.0 }
 0x82c   : > { %1017 = vadd.xlane.f32.xlu0 %v1016_v63 }
 0x842   : > { %1022 = vrot.lane.b32.xlu0 %v2023_v10, %s1854_s25  ;;  %v382_v10 = vld [vmem:[%s2217_s3 + $0x18] sm:$0xff]  ;;  %s1771_s25 = scalar_lea.vmem %s1348_s29, 128 }
 0x843   : > { %v1071_v13 = vpack.c.bf16 %v382_v10, %v382_v10  ;;  %p1772_p10 = scmp.ne.s32.totalorder %s1348_s29, %s1771_s25  ;;  %p1779_p0 = scmp.lt.s32.totalorder %s1777_s13, %s1771_s25 }
 0x845   : > { %v1076_v14 = vsel %vm493_vm2, %v1071_v13, 0  ;;  %p1773_p12 = pnand %p1772_p10, %p1944_p5  ;;  %p1780_p1 = por %p1779_p0, %p1778_p11 }
 0x846   : > { %v954_v1 = vpop.f32.mrf.mxu0  ;;  %1590 = vmatpush3.bf16.msra.mxu1 %v1076_v14 }
 0x847   : > { %v960_v20 = vadd.f32 %v954_v1, %v2090_v21  ;;  %1603 = vmatprep.subr.bf16.mxu1 %v1845_v0  ;;  %v1119_v21 = vlaneseq  ;;  %p1774_p8 = pneg %p1773_p12 }
 0x848   : > { %v1575_v2 = vpop.f32.mrf.mxu0 }
 0x849   : > { %v2135_v22 = vshrl.u32 %v1119_v21, 7  ;;  %p1781_p3 = pnand %p1780_p1, %p1774_p8 }
 0x84a   : > { %v957_v4 = vpop.f32.mrf.mxu0 }
 0x84b   : > { %v1121_v23 = vsub.s32 0, %v2135_v22  ;;  %v1141_v44 = vsub.s32 2, %v2135_v22  ;;  %v1146_v45 = vsub.s32 3, %v2135_v22 }
 0x84c   : > { %v1576_v5 = vpop.f32.mrf.mxu0 }
 0x84d   : > { %v1122_v25 = vrot.slane %v2141_v24, %v1121_v23  ;;  %v1142_v34 = vrot.slane %v2141_v24, %v1141_v44  ;;  %v1147_v48 = vrot.slane %v2141_v24, %v1146_v45 }
 0x8b5   : > { %v1018_v6 = vpop.xlane.xlu0 %1017 }
 0x8b6   : > { %1709 = vrcp.f32 %v1018_v6 }
 0x8b9   : > { %v1023_v7 = vpop.permute.xlu0 %1022 }
 0x8ba   : > { %v1028_v8 = vsel %vm493_vm2, %v1023_v7, 0 }
 0x8bb   : > { %1584 = vmatpush3.bf16.msra.mxu0 %v1028_v8 }
 0x8bc   : > { %1595 = vmatprep.subr.bf16.mxu0 %v1845_v0 }
 0x8c3   : > { %v1710_v9 = vpop.eup %1709 }
 0x8c4   : > { %v1020_v11 = vmul.f32 %v1710_v9, %v1708_v62  ;;  %v1238_v9 = vsub.s32 1, %v2135_v22 }
 0x8c6   : > { %v1021_v12 = vpack.c.bf16 %v1020_v11, %v1020_v11  ;;  %v1239_v11 = vrot.slane %v2141_v24, %v1238_v9 }
 0x8c8   : > { %1586 = vmatmul.mubr.msk.bf16.vlgmr.msra.gmra.mxu0 %vm489_vm3, %v1021_v12 }
 0x8c9   : > { %1599 = vmatprep.mubr.msk.bf16.mxu0 %vm1846_vm0, %v1845_v0  ;;  %1596 = vmatpush3.bf16.msra.mxu0 %v1689_v40 }
 0x8ca   : > { %1597 = vmatprep.subr.bf16.mxu0 %v1845_v0 }
 0x8cd   : > { %1598 = vmatpush3.bf16.msra.mxu0 %v1690_v41 }
 0x988   : > { %v1064_v15 = vpop.f32.mrf.mxu0 }
 0x989   : > { %v1070_v16 = vpack.c.bf16 %v1064_v15, %v1064_v15 }
 0x98a   : > { %v1587_v17 = vpop.f32.mrf.mxu0 }
 0x98b   : > { %1592 = vmatmul.mubr.msk.bf16.vlgmr.msra.gmra.mxu1 %vm489_vm3, %v1070_v16 }
 0x98c   : > { %v1067_v18 = vpop.f32.mrf.mxu0  ;;  %1611 = vmatprep.mubr.msk.bf16.mxu1 %vm1846_vm0, %v1845_v0  ;;  %1604 = vmatpush3.bf16.msra.mxu1 %v1691_v52 }
 0x98d   : > { %1605 = vmatprep.subr.bf16.mxu1 %v1845_v0 }
 0x98e   : > { %v1588_v19 = vpop.f32.mrf.mxu0 }
 0x990   : > { %1606 = vmatpush3.bf16.msra.mxu1 %v1692_v53 }
 0x991   : > { %1607 = vmatprep.subr.bf16.mxu1 %v1845_v0 }
 0x994   : > { %1608 = vmatpush3.bf16.msra.mxu1 %v1693_v54 }
 0x995   : > { %1609 = vmatprep.subr.bf16.mxu1 %v1845_v0 }
 0x998   : > { %1610 = vmatpush3.bf16.msra.mxu1 %v1694_v55 }
 0xa4b   : > { %v1112_v26 = vpop.f32.mrf.mxu1 }
 0xa4c   : > { %v1118_v27 = vadd.f32 %v1112_v26, %v960_v20 }
 0xa4d   : > { %v1593_v28 = vpop.f32.mrf.mxu1 }
 0xa4e   : > { %v1123_v29 = vadd.f32 %v1122_v25, %v1118_v27 }
 0xa4f   : > { %v1115_v30 = vpop.f32.mrf.mxu1 }
 0xa50   : > { %v1124_v31 = vadd.f32 %v1123_v29, %v2011_v3  ;;  %v1324_v29 = vsub.s32 4, %v2135_v22  ;;  %v1329_v30 = vsub.s32 5, %v2135_v22 }
 0xa51   : > { %v1594_v32 = vpop.f32.mrf.mxu1 }
 0xa52   : > { %v1125_v33 = vsel %vm407_vm1, %v1124_v31, 0.0 }
 0xa53   : > { %1126 = vadd.xlane.f32.xlu1 %v1125_v33 }
 0xadc   : > { %v1127_v35 = vpop.xlane.xlu1 %1126 }
 0xadd   : > { %v1129_v36 = vmul.f32 0.03125, %v1127_v35  ;;  %v1330_v35 = vrot.slane %v2141_v24, %v1329_v30 }
 0xadf   : > { %v1130_v37 = vsub.f32 %v1124_v31, %v1129_v36  ;;  %v1325_v31 = vrot.slane %v2141_v24, %v1324_v29 }
 0xae1   : > { %v1131_v38 = vmul.f32 %v1130_v37, %v1130_v37 }
 0xae3   : > { %v1132_v39 = vsel %vm407_vm1, %v1131_v38, 0.0 }
 0xae4   : > { %1133 = vadd.xlane.f32.xlu1 %v1132_v39 }
 0xb6d   : > { %v1134_v42 = vpop.xlane.xlu1 %1133 }
 0xb6e   : > { %v1135_v43 = vmul.f32 0.03125, %v1134_v42 }
 0xb70   : > { %v1136_v3 = vadd.f32 1e-12, %v1135_v43 }
 0xb72   : > { %1711 = vrsqrt.f32 %v1136_v3 }
 0xb7f   : > { %v1712_v46 = vpop.eup %1711 }
 0xb80   : > { %v1138_v47 = vmul.f32 %v1712_v46, %v1130_v37 }
 0xb82   : > { %v1143_v49 = vmul.f32 %v1142_v34, %v1138_v47 }
 0xb84   : > { %v1148_v50 = vadd.f32 %v1147_v48, %v1143_v49 }
 0xb86   : > { %v1149_v51 = vpack.c.bf16 %v1148_v50, %v1148_v50 }
 0xb88   : > { %1600 = vmatmul.mubr.msk.bf16.vlgmr.msra.gmra.mxu0 %vm407_vm1, %v1149_v51 }
 0xc48   : > { %v1210_v57 = vpop.f32.mrf.mxu0 }
 0xc49   : > { %v1211_v58 = vadd.f32 %v1467_v56, %v1210_v57 }
 0xc4a   : > { %v1601_v59 = vpop.f32.mrf.mxu0 }
 0xc4b   : > { %v1216_v60 = vmin.f32 %v1211_v58, 20.0  ;;  %vm1224_vm4 = vcmp.gt.f32.partialorder %v1211_v58, 20.0 }
 0xc4c   : > { %v1213_v61 = vpop.f32.mrf.mxu0 }
 0xc4d   : > { %v1217_v62 = vmul.f32 1.442695, %v1216_v60 }
 0xc4e   : > { %v1602_v63 = vpop.f32.mrf.mxu0 }
 0xc4f   : > { %1713 = vpow2.f32 %v1217_v62 }
 0xc5c   : > { %v1714_v1 = vpop.eup %1713 }
 0xc5d   : > { %v1219_v20 = vadd.f32 2.0, %v1714_v1 }
 0xc5f   : > { %v1220_v0 = vmul.f32 %v1714_v1, %v1219_v20 }
 0xc61   : > { %v1221_v2 = vadd.f32 2.0, %v1220_v0 }
 0xc63   : > { %1715 = vrcp.f32 %v1221_v2 }
 0xc70   : > { %v1716_v4 = vpop.eup %1715 }
 0xc71   : > { %v1223_v5 = vmul.f32 %v1716_v4, %v1220_v0 }
 0xc73   : > { %v1225_v6 = vmul.f32 %v1223_v5, %v1211_v58 }
 0xc75   : > { %v1226_v7 = vsel %vm1224_vm4, %v1211_v58, %v1225_v6 }
 0xc76   : > { %v1227_v8 = vpack.c.bf16 %v1226_v7, %v1226_v7 }
 0xc78   : > { %1612 = vmatmul.mubr.msk.bf16.vlgmr.msra.gmra.mxu1 %vm1264_vm5, %v1227_v8 }
 0xd38   : > { %v1302_v12 = vpop.f32.mrf.mxu1 }
 0xd39   : > { %v1303_v10 = vadd.f32 %v1302_v12, %v1239_v11 }
 0xd3a   : > { %v1613_v13 = vpop.f32.mrf.mxu1 }
 0xd3b   : > { %v1308_v14 = vadd.f32 %v1303_v10, %v1148_v50 }
 0xd3c   : > { %v1305_v15 = vpop.f32.mrf.mxu1 }
 0xd3d   : > { %v1309_v16 = vsel %vm407_vm1, %v1308_v14, 0.0 }
 0xd3e   : > { %1310 = vadd.xlane.f32.xlu1 %v1309_v16  ;;  %v1614_v17 = vpop.f32.mrf.mxu1 }
 0xdc7   : > { %v1311_v18 = vpop.xlane.xlu1 %1310 }
 0xdc8   : > { %v1312_v19 = vmul.f32 0.03125, %v1311_v18 }
 0xdca   : > { %v1313_v21 = vsub.f32 %v1308_v14, %v1312_v19 }
 0xdcc   : > { %v1314_v23 = vmul.f32 %v1313_v21, %v1313_v21 }
 0xdce   : > { %v1315_v25 = vsel %vm407_vm1, %v1314_v23, 0.0 }
 0xdcf   : > { %1316 = vadd.xlane.f32.xlu1 %v1315_v25 }
 0xe58   : > { %v1317_v26 = vpop.xlane.xlu1 %1316 }
 0xe59   : > { %v1318_v27 = vmul.f32 0.03125, %v1317_v26 }
 0xe5b   : > { %v1319_v28 = vadd.f32 1e-12, %v1318_v27 }
 0xe5d   : > { %1717 = vrsqrt.f32 %v1319_v28 }
 0xe6a   : > { %v1718_v32 = vpop.eup %1717 }
 0xe6b   : > { %v1321_v33 = vmul.f32 %v1718_v32, %v1313_v21 }
 0xe6d   : > { %v1326_v36 = vmul.f32 %v1325_v31, %v1321_v33 }
 0xe6f   : > { %v1331_v37 = vadd.f32 %v1330_v35, %v1326_v36 }
 0xe71   : > { %1332 = vst.msk [vmem:[%s366_s28] sm:$0xff] %vm407_vm1, %v1331_v37 }
 0xe72   : > { %1784 = shalt.err (!%p1781_p3)
}
 0xe73   : > { %s1785_s26 = scalar_lea.hbm %s1345_s17, 128  ;;  %s1789_s28 = scalar_lea.hbm %s2223_s9, 256 }
 0xe74   : > { %p1786_p2 = scmp.ne.s32.totalorder %s1345_s17, %s1785_s26  ;;  %p1790_p7 = scmp.lt.s32.totalorder %s1345_s17, %s2223_s9 }
 0xe75   : > { %p1791_p6 = scmp.lt.s32.totalorder %s1789_s28, %s1785_s26 }
 0xe76   : > { %p1787_p4 = pnand %p1786_p2, %p1944_p5 }
 0xe77   : > { %p1792_p9 = por %p1791_p6, %p1790_p7 }
 0xe78   : > { %p1788_p13 = pneg %p1787_p4 }
 0xe7a   : > { %p1793_p10 = pnand %p1792_p9, %p1788_p13 }
 0xe7c   : > { %1796 = shalt.err (!%p1793_p10)
}
 0xe7d   : > { %1623 = dma.vmem_to_hbm [thread:$0]  (%p1944_p5), %s1348_s29, 128, %s1345_s17, %s1334_s22  }
 0xe7e PF: > { %p1640_p12 = scmp.ge.s32.totalorder %s1839_s12, 2  ;;  %s1359_s25 = sand.u32 1, %s1827_s30  }
 0xe7f   : > { %p2233_p8 = scmp.ne.s32.totalorder %s2226_s20, 0  ;;  %s1360_s21 = scalar_lea.sflag [#allocation4], %s1359_s25 }
 0xe81   : > { %p1633_p11 = pnand %p1640_p12, %p2233_p8 }
 0xe83   : > { %p1634_p0 = pneg %p1633_p11 }
 0xe85   : > { %1822 = dma.done.wait (%p1634_p0), %s1360_s21, 128  }
 0xe86   : > { %1824 = vsyncadd (%p1634_p0), %s1360_s21, 4294967168  ;;  %p21_p1 = scmp.ge.s32.totalorder %s1931_s15, 4   ;;  %s2234_s30 = smov %s1831_s10 }
 0xe87   : > { %s2235_s10 = smov %s1835_s11  ;;  %s2236_s11 = smov %s1942_s18 }
 0xe88   : > { %s2237_s12 = smov %s1931_s15  ;;  %23 = sbr.rel (!%p21_p1) target bundleno = 5 (0x5), region = 103 }
 0xe8d   :  { %1365 = vsyncpa [#allocation3], 1 }
 0xe8e   :  { %1367 = vsyncpa [#allocation3 + $0x1], 1 }
 0xe8f   :  { %1368 = vsyncpa [#allocation6], 1 }
 0xe90   :  { %1369 = vsyncpa [#allocation4], 1 }
 0xe91   :  { %1371 = vsyncpa [#allocation4 + $0x1], 1 }

</bundles_post_ra>
